<compile_context>
chip_gen: v6e
topology: v6e:2x2x1
jax: 0.10.0
libtpu: 0.0.40
codegen_flags: <defaults>
</compile_context>

<pallas_src>
import jax
import jax.numpy as jnp
from jax.experimental import pallas as pl
from jax.experimental.pallas import tpu as pltpu

_TARGET_BLOCK_BYTES = 2 * 1024 * 1024  # ~2 MiB per VMEM buffer
_LANE = 128


def _hardtanh_kernel(x_ref, o_ref):
    # Elementwise clamp to [-1, 1] on the VPU, in the input dtype.
    x = x_ref[...]
    one = jnp.ones((), dtype=x.dtype)
    o_ref[...] = jnp.minimum(jnp.maximum(x, -one), one)


def _choose_width(n):
    """Largest lane-dense width (multiple of 128) that divides n exactly."""
    for w in (8192, 4096, 2048, 1024, 512, 256, 128):
        if n % w == 0:
            return w
    return None


def binarizer_forward(x: jax.Array) -> jax.Array:
    """Hardtanh(x) = clamp(x, -1, 1), computed in a Pallas TPU kernel."""
    orig_shape = x.shape
    orig_dtype = x.dtype
    n = x.size
    if n == 0:
        return x

    itemsize = x.dtype.itemsize
    flat = x.reshape(-1)

    width = _choose_width(n)
    pad = 0
    if width is None:
        # Rare fallback (element count not a multiple of 128): tail-pad only.
        width = _LANE
        padded_n = ((n + width - 1) // width) * width
        pad = padded_n - n
        flat = jnp.pad(flat, (0, pad))

    rows = flat.shape[0] // width
    x2d = flat.reshape(rows, width)

    # Rows per block: target ~2 MiB/buffer, multiple of 8 sublanes, <= rows.
    block_rows = max(8, _TARGET_BLOCK_BYTES // (width * itemsize))
    block_rows = (block_rows // 8) * 8
    if block_rows > rows:
        block_rows = rows  # whole-dim block (valid even if not a multiple of 8)

    grid = (pl.cdiv(rows, block_rows),)

    out2d = pl.pallas_call(
        _hardtanh_kernel,
        out_shape=jax.ShapeDtypeStruct((rows, width), orig_dtype),
        grid_spec=pl.GridSpec(
            grid=grid,
            in_specs=[pl.BlockSpec((block_rows, width), lambda i: (i, 0))],
            out_specs=pl.BlockSpec((block_rows, width), lambda i: (i, 0)),
        ),
        compiler_params=pltpu.CompilerParams(
            dimension_semantics=("parallel",),
            vmem_limit_bytes=32 * 1024 * 1024,  # raises v5e's 16 MiB default; safe on v6e/v7x
        ),
    )(x2d)

    if pad:
        out = out2d.reshape(-1)[:n].reshape(orig_shape)
    else:
        out = out2d.reshape(orig_shape)
    return out


if __name__ == "__main__":
    key = jax.random.PRNGKey(0)
    # Small NCHW input consistent with a conv-style module: (N=2, C=4, H=16, W=16)
    x = jax.random.normal(key, (2, 4, 16, 16), dtype=jnp.float32) * 2.0

    y = jax.block_until_ready(binarizer_forward(x))

    # Reference check (pure JAX hardtanh).
    y_ref = jnp.clip(x, -1.0, 1.0)
    assert y.shape == x.shape and y.dtype == x.dtype
    assert jnp.allclose(y, y_ref, atol=0.0, rtol=0.0), "mismatch vs reference"

    print("KERNEL_OK")
</pallas_src>

<mosaic_0001>
module attributes {stable_mosaic.version = 11 : i64} {
  func.func @_hardtanh_kernel(%arg0: i32, %arg1: memref<1x2048xf32, #tpu.memory_space<vmem>>, %arg2: memref<1x2048xf32, #tpu.memory_space<vmem>>) attributes {dimension_semantics = [#tpu.dimension_semantics<parallel>], iteration_bounds = array<i64: 1>, scalar_prefetch = 0 : i64, scratch_operands = 0 : i64, tpu.core_type = #tpu.core_type<tc>, window_params = [{transform_indices = @transform_0, window_bounds = array<i64: 1, 2048>}, {transform_indices = @transform_1, window_bounds = array<i64: 1, 2048>}]} {
    %c0 = arith.constant 0 : index
    %c0_0 = arith.constant 0 : index
    %0 = vector.load %arg1[%c0, %c0_0] : memref<1x2048xf32, #tpu.memory_space<vmem>>, vector<1x2048xf32>
    %cst = arith.constant 0.000000e+00 : f32
    %cst_1 = arith.constant 1.000000e+00 : f32
    %1 = arith.subf %cst, %cst_1 : f32
    %2 = vector.broadcast %1 : f32 to vector<1x2048xf32>
    %3 = arith.maximumf %0, %2 : vector<1x2048xf32>
    %cst_2 = arith.constant 1.000000e+00 : f32
    %4 = vector.broadcast %cst_2 : f32 to vector<1x2048xf32>
    %5 = arith.minimumf %3, %4 : vector<1x2048xf32>
    %c0_3 = arith.constant 0 : index
    %c0_4 = arith.constant 0 : index
    %6 = vector.load %arg2[%c0_3, %c0_4] : memref<1x2048xf32, #tpu.memory_space<vmem>>, vector<1x2048xf32>
    tpu.vector_store %arg2[%c0_3, %c0_4], %5 {strides = array<i32>} : memref<1x2048xf32, #tpu.memory_space<vmem>>, vector<1x2048xf32>,
    return
  }
  func.func @transform_0(%arg0: i32) -> (i32, i32) {
    %c0_i32 = arith.constant 0 : i32
    %c0_i32_0 = arith.constant 0 : i32
    return %arg0, %c0_i32 : i32, i32
  }
  func.func @transform_1(%arg0: i32) -> (i32, i32) {
    %c0_i32 = arith.constant 0 : i32
    %c0_i32_0 = arith.constant 0 : i32
    return %arg0, %c0_i32 : i32, i32
  }
}

</mosaic_0001>

<bundles_post_ra>
// kernel: tpu_custom_call.1
= control target key start
LH: loop header
LB: loop body
LE: loop exit
PB: predicated region body
PF: predicated region fallthrough
CT: control target
= control target key end

     0   :  { %6 = vsyncpa [#allocation3], 0  ;;  %s110_s0 = inlined_call_operand.hbm [shape: f32[1,2048], index: 0, kind: input, shape index: {}]   ;;  %s111_s1 = inlined_call_operand.hbm [shape: f32[1,2048], index: 1, kind: output, shape index: {}]  }
   0x1   :  { %7 = vsyncpa [#allocation4], 0  ;;  %s92_s6 = smov [#allocation2]  }
   0x2   :  { %s14_s7 = sshll.u32 %s92_s6, 4  ;;  %s15_s7 = int_to_ptr.vmem [resolvable:$true] %s14_s7 }
   0x3   :  { %s56_s8 = scalar_lea.vmem %s15_s7, 256  ;;  %p61_p1 = scmp.lt.s32.totalorder %s15_s7, %s15_s7 }
   0x4   :  { %p57_p0 = scmp.ne.s32.totalorder %s15_s7, %s56_s8  ;;  %p62_p2 = scmp.lt.s32.totalorder %s56_s8, %s56_s8 }
   0x6   :  { %p63_p3 = por %p62_p2, %p61_p1 }
   0x8   :  { %p64_p4 = pnand %p63_p3, %p57_p0 }
   0xa   :  { %67 = shalt.err (!%p64_p4)
}
   0xb   :  { %17 = dma.hbm_to_vmem [thread:$0]  %s110_s0, 256, %s15_s7, [#allocation3]  }
   0xc   :  { %88 = dma.done.wait [#allocation3], 256  }
   0xd   :  { %89 = vsyncadd [#allocation3], 4294967040  ;;  %s93_s11 = smov [#allocation5]   ;;  %v21_v0 = vld [vmem:[#allocation2] sm:$0xff]  ;;  %v22_v1 = vld [vmem:[#allocation2 + $0x8] sm:$0xff] }
   0xe   :  { %s35_s12 = sshll.u32 %s93_s11, 4  ;;  %v44_v2 = vclamps-f32 %v21_v0, 1.0  ;;  %v45_v3 = vclamps-f32 %v22_v1, 1.0  ;;  %s36_s12 = int_to_ptr.vmem [resolvable:$true] %s35_s12 }
   0xf   :  { %s68_s13 = scalar_lea.vmem %s36_s12, 256  ;;  %p73_p6 = scmp.lt.s32.totalorder %s36_s12, %s36_s12 }
  0x10   :  { %27 = vst [vmem:[#allocation5] sm:$0xff] %v44_v2  ;;  %28 = vst [vmem:[#allocation5 + $0x8] sm:$0xff] %v45_v3  ;;  %p69_p5 = scmp.ne.s32.totalorder %s36_s12, %s68_s13  ;;  %p74_p7 = scmp.lt.s32.totalorder %s68_s13, %s68_s13 }
  0x12   :  { %p75_p8 = por %p74_p7, %p73_p6 }
  0x14   :  { %p76_p9 = pnand %p75_p8, %p69_p5 }
  0x16   :  { %79 = shalt.err (!%p76_p9)
}
  0x17   :  { %38 = dma.vmem_to_hbm [thread:$0]  %s36_s12, 256, %s111_s1, [#allocation4]  }
  0x18   :  { %90 = dma.done.wait [#allocation4], 256  }
  0x19   :  { %91 = vsyncadd [#allocation4], 4294967040 }
  0x1a   :  { %42 = vsyncpa [#allocation3], 1 }
  0x1b   :  { %43 = vsyncpa [#allocation4], 1 }

</bundles_post_ra>
